<compile_context>
chip_gen: v7x
topology: tpu7x:2x2x1
jax: 0.10.0
libtpu: 0.0.40
codegen_flags: <defaults>
</compile_context>

<pallas_src>
import jax
import jax.numpy as jnp
from jax.experimental import pallas as pl
from jax.experimental.pallas import tpu as pltpu

_EPS = 1e-8  # torch.nn.CosineSimilarity default eps


def _cosine_loss_kernel(x_ref, y_ref, o_ref):
    # x_ref / y_ref: (TB, C, TILE_HW) tiles; o_ref: (TB, TILE_HW).
    x = x_ref[...].astype(jnp.float32)
    y = y_ref[...].astype(jnp.float32)

    # Reductions over the channel axis (axis=1), matching torch dim=1.
    w12 = jnp.sum(x * y, axis=1)  # (TB, TILE_HW)  x·y
    w1 = jnp.sum(x * x, axis=1)   # (TB, TILE_HW)  ||x||^2
    w2 = jnp.sum(y * y, axis=1)   # (TB, TILE_HW)  ||y||^2

    # ATen: cos = w12 / sqrt(clamp_min(w1*w2, eps^2)); rsqrt*mul = one EUP push.
    inv_denom = jax.lax.rsqrt(jnp.maximum(w1 * w2, jnp.float32(_EPS * _EPS)))
    o_ref[...] = (1.0 - w12 * inv_denom).astype(o_ref.dtype)


def _round_up(x, m):
    return ((x + m - 1) // m) * m


def _vmem_capacity_bytes():
    """Physical per-core VMEM for the current generation (v7x-safe fallback)."""
    try:
        info = pltpu.get_tpu_info()
        cap = getattr(info, "vmem_capacity_bytes", None)
        if cap:
            return int(cap)
    except Exception:
        pass
    return 64 * 1024 * 1024  # v7x per-TensorCore VMEM; safe everywhere.


def _per_lane_bytes(c, tb, itemsize, nbuf):
    """VMEM bytes needed per lane of tile width.

    2 inputs x nbuf pipeline buffers in the input dtype, plus ~3 live f32
    temporaries in the kernel body (x_f32, y_f32, one product), plus 2 f32
    output pipeline buffers (C-free, tiny).
    """
    return 2 * nbuf * tb * c * itemsize + 3 * tb * c * 4 + 2 * tb * 4


def _choose_tile_hw(hw, c, tb, itemsize, nbuf, budget):
    """Balanced, multiple-of-128 lane tile fitting the VMEM budget."""
    hw128 = _round_up(hw, 128)
    per_lane = _per_lane_bytes(c, tb, itemsize, nbuf)
    max_lanes = max(128, (budget // per_lane) // 128 * 128)
    max_lanes = min(max_lanes, 8192)
    if hw128 <= max_lanes:
        return int(hw128)
    n_tiles = pl.cdiv(hw128, max_lanes)
    return int(min(_round_up(pl.cdiv(hw, n_tiles), 128), hw128))


def _input_spec(block_shape, index_map, extra_buffering):
    if extra_buffering:
        try:
            return pl.BlockSpec(block_shape, index_map,
                                pipeline_mode=pl.Buffered(3))
        except Exception:
            pass  # older/newer API without pipeline_mode: plain double-buffer.
    return pl.BlockSpec(block_shape, index_map)


def transform_loss(x, y):
    """1 - cosine_similarity(x, y, dim=1, eps=1e-8). x, y: (B, C, H, W)."""
    assert x.shape == y.shape
    B, C, H, W = x.shape
    HW = H * W
    itemsize = jnp.dtype(x.dtype).itemsize

    # Batch rows per grid step: 8 (sublane-dense output stores) or the full B.
    TB = 8 if B >= 8 else B

    vmem_cap = _vmem_capacity_bytes()
    budget = int(vmem_cap * 0.45)   # pipeline buffers + f32 working set budget

    TILE_HW = _choose_tile_hw(HW, C, TB, itemsize, nbuf=2, budget=budget)
    grid_b = pl.cdiv(B, TB)
    grid_hw = pl.cdiv(HW, TILE_HW)

    # v7x has 2 TensorCores: make sure a (1,1) grid is split so neither idles.
    if grid_b * grid_hw < 2 and TILE_HW >= 256:
        TILE_HW = int(_round_up(pl.cdiv(HW, 2), 128))
        grid_hw = pl.cdiv(HW, TILE_HW)

    # Small-lane tiles (large C squeezing TILE_HW): deepen input pipelining to
    # hide the many short strided-row DMAs, if it still fits comfortably.
    extra_buffering = (
        TILE_HW <= 512
        and grid_hw >= 4
        and _per_lane_bytes(C, TB, itemsize, 3) * TILE_HW <= int(vmem_cap * 0.6)
    )
    nbuf = 3 if extra_buffering else 2

    needed = _per_lane_bytes(C, TB, itemsize, nbuf) * TILE_HW
    vmem_limit = int(min(max(needed + needed // 2, 16 * 1024 * 1024),
                         int(vmem_cap * 0.75)))

    xf = x.reshape(B, C, HW)
    yf = y.reshape(B, C, HW)

    out = pl.pallas_call(
        _cosine_loss_kernel,
        out_shape=jax.ShapeDtypeStruct((B, HW), jnp.float32),
        grid=(int(grid_b), int(grid_hw)),
        in_specs=[
            _input_spec((TB, C, TILE_HW), lambda b, h: (b, 0, h), extra_buffering),
            _input_spec((TB, C, TILE_HW), lambda b, h: (b, 0, h), extra_buffering),
        ],
        out_specs=pl.BlockSpec((TB, TILE_HW), lambda b, h: (b, h)),
        compiler_params=pltpu.CompilerParams(
            dimension_semantics=("parallel", "parallel"),
            vmem_limit_bytes=vmem_limit,
        ),
    )(xf, yf)

    return out.reshape(B, H, W)


def _reference(x, y):
    x = x.astype(jnp.float32)
    y = y.astype(jnp.float32)
    w12 = jnp.sum(x * y, axis=1)
    w1 = jnp.sum(x * x, axis=1)
    w2 = jnp.sum(y * y, axis=1)
    denom = jnp.sqrt(jnp.maximum(w1 * w2, _EPS * _EPS))
    return 1.0 - w12 / denom


if __name__ == "__main__":
    key = jax.random.PRNGKey(0)
    kx, ky = jax.random.split(key)
    B, C, H, W = 2, 4, 16, 16
    x = jax.random.normal(kx, (B, C, H, W), dtype=jnp.float32)
    y = jax.random.normal(ky, (B, C, H, W), dtype=jnp.float32)

    out = transform_loss(x, y)
    out = jax.block_until_ready(out)

    ref = _reference(x, y)
    assert out.shape == (B, H, W)
    assert jnp.allclose(out, ref, atol=1e-5, rtol=1e-5)

    print("KERNEL_OK")
</pallas_src>

<mosaic_0001>
module attributes {stable_mosaic.version = 11 : i64} {
  func.func @_cosine_loss_kernel(%arg0: i32, %arg1: i32, %arg2: memref<2x4x128xf32, #tpu.memory_space<vmem>>, %arg3: memref<2x4x128xf32, #tpu.memory_space<vmem>>, %arg4: memref<2x128xf32, #tpu.memory_space<vmem>>) attributes {dimension_semantics = [#tpu.dimension_semantics<parallel>, #tpu.dimension_semantics<parallel>], iteration_bounds = array<i64: 1, 2>, scalar_prefetch = 0 : i64, scratch_operands = 0 : i64, tpu.core_type = #tpu.core_type<tc>, window_params = [{transform_indices = @transform_0, window_bounds = array<i64: 2, 4, 128>}, {transform_indices = @transform_1, window_bounds = array<i64: 2, 4, 128>}, {transform_indices = @transform_2, window_bounds = array<i64: 2, 128>}]} {
    %c0 = arith.constant 0 : index
    %c0_0 = arith.constant 0 : index
    %c0_1 = arith.constant 0 : index
    %0 = vector.load %arg2[%c0, %c0_0, %c0_1] : memref<2x4x128xf32, #tpu.memory_space<vmem>>, vector<2x4x128xf32>
    %c0_2 = arith.constant 0 : index
    %c0_3 = arith.constant 0 : index
    %c0_4 = arith.constant 0 : index
    %1 = vector.load %arg3[%c0_2, %c0_3, %c0_4] : memref<2x4x128xf32, #tpu.memory_space<vmem>>, vector<2x4x128xf32>
    %2 = arith.mulf %0, %1 : vector<2x4x128xf32>
    %cst = arith.constant dense<0.000000e+00> : vector<2x128xf32>
    %3 = vector.multi_reduction <add>, %2, %cst [1] : vector<2x4x128xf32> to vector<2x128xf32>
    %4 = arith.mulf %0, %0 : vector<2x4x128xf32>
    %cst_5 = arith.constant dense<0.000000e+00> : vector<2x128xf32>
    %5 = vector.multi_reduction <add>, %4, %cst_5 [1] : vector<2x4x128xf32> to vector<2x128xf32>
    %6 = arith.mulf %1, %1 : vector<2x4x128xf32>
    %cst_6 = arith.constant dense<0.000000e+00> : vector<2x128xf32>
    %7 = vector.multi_reduction <add>, %6, %cst_6 [1] : vector<2x4x128xf32> to vector<2x128xf32>
    %8 = arith.mulf %5, %7 : vector<2x128xf32>
    %cst_7 = arith.constant 1.000000e-16 : f32
    %9 = vector.broadcast %cst_7 : f32 to vector<2x128xf32>
    %10 = arith.maximumf %8, %9 : vector<2x128xf32>
    %11 = math.rsqrt %10 : vector<2x128xf32>
    %12 = arith.mulf %3, %11 : vector<2x128xf32>
    %cst_8 = arith.constant 1.000000e+00 : f32
    %13 = vector.broadcast %cst_8 : f32 to vector<2x128xf32>
    %14 = arith.subf %13, %12 : vector<2x128xf32>
    %c0_9 = arith.constant 0 : index
    %c0_10 = arith.constant 0 : index
    %15 = vector.load %arg4[%c0_9, %c0_10] : memref<2x128xf32, #tpu.memory_space<vmem>>, vector<2x128xf32>
    tpu.vector_store %arg4[%c0_9, %c0_10], %14 {strides = array<i32>} : memref<2x128xf32, #tpu.memory_space<vmem>>, vector<2x128xf32>,
    return
  }
  func.func @transform_0(%arg0: i32, %arg1: i32) -> (i32, i32, i32) {
    %c0_i32 = arith.constant 0 : i32
    %c0_i32_0 = arith.constant 0 : i32
    return %arg0, %c0_i32, %arg1 : i32, i32, i32
  }
  func.func @transform_1(%arg0: i32, %arg1: i32) -> (i32, i32, i32) {
    %c0_i32 = arith.constant 0 : i32
    %c0_i32_0 = arith.constant 0 : i32
    return %arg0, %c0_i32, %arg1 : i32, i32, i32
  }
  func.func @transform_2(%arg0: i32, %arg1: i32) -> (i32, i32) {
    %c0_i32 = arith.constant 0 : i32
    return %arg0, %arg1 : i32, i32
  }
}

</mosaic_0001>

<bundles_post_ra>
// kernel: tpu_custom_call.1
= control target key start
LH: loop header
LB: loop body
LE: loop exit
PB: predicated region body
PF: predicated region fallthrough
CT: control target
= control target key end

     0   :  { %7 = vsyncpa [#allocation3], 0  ;;  %s916_s0 = inlined_call_operand.hbm [shape: f32[2,4,256], index: 0, kind: input, shape index: {}]   ;;  %s917_s1 = inlined_call_operand.hbm [shape: f32[2,4,256], index: 1, kind: input, shape index: {}]   ;;  %s918_s2 = inlined_call_operand.hbm [shape: f32[2,256], index: 2, kind: output, shape index: {}]  }
   0x1   :  { %9 = vsyncpa [#allocation3 + $0x1], 0 }
   0x2   :  { %10 = vsyncpa [#allocation6], 0 }
   0x3   :  { %12 = vsyncpa [#allocation6 + $0x1], 0 }
   0x4   :  { %13 = vsyncpa [#allocation4], 0 }
   0x5   :  { %15 = vsyncpa [#allocation4 + $0x1], 0  ;;  %s677_s9 = smov 0   ;;  %s679_s10 = smov 0  }
   0x6   :  { %s681_s11 = smov 0   ;;  %s683_s12 = smov 0  }
   0x7   :  { %s685_s13 = smov 0   ;;  %s687_s14 = smov 0  }
   0x8 LB: > { %s418_s15 = sadd.s32 4294967295, %s654_s14   ;;  %s419_s16 = sadd.s32 4294967294, %s654_s14   ;;  %s654_s14 = sphi %s687_s14, %s21_s14   ;;  %s650_s13 = sphi %s685_s13, %s935_s13   ;;  %s646_s12 = sphi %s683_s12, %s934_s12   ;;  %s642_s11 = sphi %s681_s11, %s933_s11   ;;  %s638_s10 = sphi %s679_s10, %s932_s10   ;;  %s634_s9 = sphi %s677_s9, %s931_s9  }
   0x9   : > { %s30_s17 = sadd.s32 1, %s650_s13  ;;  %s42_s18 = sadd.s32 1, %s642_s11 }
   0xa   : > { %p31_p0 = scmp.ge.s32.totalorder %s30_s17, 2  ;;  %p49_p1 = scmp.ne.s32.totalorder %s642_s11, %s638_s10 }
   0xb   : > { %p50_p2 = scmp.eq.s32.totalorder %s654_s14, 0  ;;  %p55_p3 = scmp.ne.s32.totalorder %s638_s10, %s634_s9 }
   0xc   : > { %s937_s17 = smov (%p31_p0, %s30_s17), 0  ;;  %p56_p5 = scmp.eq.s32.totalorder %s418_s15, 0 }
   0xd   : > { %p718_p4 = por %p50_p2, %p49_p1  ;;  %s38_s20 = ssub.s32 %s650_s13, %s937_s17 }
   0xe   : > { %p109_p6 = scmp.eq.s32.totalorder %s418_s15, 1  ;;  %p40_p7 = scmp.eq.s32.totalorder %s38_s20, 0 }
   0xf   : > { %p724_p8 = por %p56_p5, %p55_p3  ;;  %p115_p10 = scmp.eq.s32.totalorder %s419_s16, 1 }
  0x10   : > { %p728_p9 = por %p109_p6, %p49_p1  ;;  %p451_p13 = scmp.lt.s32.totalorder %s654_s14, 2 }
  0x11   : > { %s922_s21 = scalar_select %p724_p8, 1, 0 }
  0x12   : > { %s923_s22 = scalar_select %p728_p9, 1, 0 }
  0x13   : > { %s733_s23 = scalar_select %p40_p7, %s642_s11, %s42_s18  }
  0x14   : > { %p735_p11 = por %p115_p10, %p55_p3  ;;  %s742_s25 = sand.u32 1, %s642_s11  }
  0x15   : > { %s422_s26 = sshll.u32 %s742_s25, 3  ;;  %s423_s27 = sshll.u32 %s650_s13, 6 }
  0x16   : > { %s924_s24 = scalar_select %p735_p11, 1, 0 }
  0x17   : > { %s751_s30 = scalar_lea.hbm %s916_s0, %s423_s27  ;;  %s139_s3 = scalar_lea.vmem [#allocation2], %s422_s26 }
  0x18   : > { %s148_s4 = sshll.u32 %s139_s3, 4  ;;  %p759_p0 = pnand %p451_p13, %p718_p4  ;;  %s755_s4 = int_to_ptr.vmem [resolvable:$true] %s148_s4 }
  0x19   : > { %s136_s6 = scalar_lea.sflag [#allocation3], %s742_s25  ;;  %s508_s7 = scalar_lea.hbm %s751_s30, 128 }
  0x1a   : > { %p509_p1 = scmp.ne.s32.totalorder %s751_s30, %s508_s7  ;;  %p510_p2 = pneg %p759_p0 }
  0x1b   : > { %s513_s16 = scalar_lea.hbm %s916_s0, 256  ;;  %p514_p4 = scmp.lt.u32.totalorder %s751_s30, %s916_s0 }
  0x1c   : > { %p511_p3 = pnand %p510_p2, %p509_p1  ;;  %p515_p6 = scmp.lt.u32.totalorder %s513_s16, %s508_s7 }
  0x1d   : > { %p517_p10 = scmp.lt.u32.totalorder %s508_s7, %s751_s30 }
  0x1e   : > { %p512_p5 = pneg %p511_p3  ;;  %p516_p7 = por %p515_p6, %p514_p4 }
  0x20   : > { %p518_p13 = por %p517_p10, %p516_p7 }
  0x22   : > { %p519_p12 = pnand %p518_p13, %p512_p5 }
  0x24   : > { %522 = shalt.err (!%p519_p12)
}
  0x25   : > { %s523_s20 = scalar_lea.vmem %s755_s4, 128  ;;  %s656_s28 = smov [#allocation2]  }
  0x26   : > { %p524_p1 = scmp.ne.s32.totalorder %s755_s4, %s523_s20  ;;  %s528_s29 = sshll.u32 %s656_s28, 4  ;;  %s529_s29 = int_to_ptr.vmem [resolvable:$false] %s528_s29 }
  0x27   : > { %s530_s3 = scalar_lea.vmem %s529_s29, 256  ;;  %p531_p9 = scmp.lt.s32.totalorder %s755_s4, %s529_s29 }
  0x28   : > { %p526_p3 = pnand %p524_p1, %p510_p2  ;;  %p532_p4 = scmp.lt.s32.totalorder %s530_s3, %s523_s20 }
  0x2a   : > { %p527_p11 = pneg %p526_p3  ;;  %p533_p6 = por %p532_p4, %p531_p9 }
  0x2c   : > { %p534_p7 = pnand %p533_p6, %p527_p11 }
  0x2e   : > { %537 = shalt.err (!%p534_p7)
}
  0x2f   : > { %s657_s7 = smov 128   ;;  %s658_s8 = smov 64  }
  0x30   : > { %s659_s15 = smov 4   ;;  %p426_p9 = scmp.ge.s32.totalorder %s654_s14, 1 }
  0x31   : > { %443 = dma.hbm_to_vmem [thread:$0]  (!%p759_p0), %s751_s30, 128, %s755_s4, %s136_s6, %s657_s7, %s658_s8, %s659_s15  }
  0x32   : > { %p179_p11 = scmp.lt.s32.totalorder %s654_s14, 3  ;;  %s805_s20 = scalar_lea.hbm %s917_s1, %s423_s27 }
  0x33   : > { %s162_s28 = scalar_lea.vmem [#allocation5], %s422_s26  ;;  %s159_s30 = scalar_lea.sflag [#allocation6], %s742_s25 }
  0x34   : > { %p796_p12 = pnand %p426_p9, %p179_p11  ;;  %s171_s29 = sshll.u32 %s162_s28, 4  ;;  %s809_s29 = int_to_ptr.vmem [resolvable:$true] %s171_s29 }
  0x35   : > { %s538_s4 = scalar_lea.hbm %s805_s20, 128  ;;  %s543_s27 = scalar_lea.hbm %s917_s1, 256 }
  0x36   : > { %p539_p5 = scmp.ne.s32.totalorder %s805_s20, %s538_s4  ;;  %p544_p1 = scmp.lt.u32.totalorder %s805_s20, %s917_s1 }
  0x37   : > { %p545_p3 = scmp.lt.u32.totalorder %s543_s27, %s538_s4  ;;  %p547_p6 = scmp.lt.u32.totalorder %s538_s4, %s805_s20 }
  0x38   : > { %p541_p10 = pnand %p539_p5, %p510_p2 }
  0x39   : > { %p546_p4 = por %p545_p3, %p544_p1 }
  0x3a   : > { %p542_p13 = pneg %p541_p10 }
  0x3b   : > { %p548_p7 = por %p547_p6, %p546_p4 }
  0x3d   : > { %p549_p9 = pnand %p548_p7, %p542_p13 }
  0x3f   : > { %552 = shalt.err (!%p549_p9)
}
  0x40   : > { %s553_s26 = scalar_lea.vmem %s809_s29, 128  ;;  %s660_s28 = smov [#allocation5]  }
  0x41   : > { %p554_p11 = scmp.ne.s32.totalorder %s809_s29, %s553_s26  ;;  %s558_s6 = sshll.u32 %s660_s28, 4  ;;  %s559_s6 = int_to_ptr.vmem [resolvable:$false] %s558_s6 }
  0x42   : > { %s560_s3 = scalar_lea.vmem %s559_s6, 256  ;;  %p561_p8 = scmp.lt.s32.totalorder %s809_s29, %s559_s6 }
  0x43   : > { %p556_p5 = pnand %p554_p11, %p510_p2  ;;  %p562_p1 = scmp.lt.s32.totalorder %s560_s3, %s553_s26 }
  0x45   : > { %p557_p10 = pneg %p556_p5  ;;  %p563_p3 = por %p562_p1, %p561_p8 }
  0x47   : > { %p564_p4 = pnand %p563_p3, %p557_p10 }
  0x49   : > { %567 = shalt.err (!%p564_p4)
}
  0x4a   : > { %446 = dma.hbm_to_vmem [thread:$0]  (!%p759_p0), %s805_s20, 128, %s809_s29, %s159_s30, %s657_s7, %s658_s8, %s659_s15  }
  0x4b   : > { %183 = sbr.rel (%p796_p12) target bundleno = 137 (0x89), region = 28  ;;  %s843_s4 = sand.u32 (!%p796_p12), 1, %s638_s10  }
  0x4c   : > { %s427_s27 = sshll.u32 (!%p796_p12), %s843_s4, 3  ;;  %s186_s18 = scalar_lea.sflag (!%p796_p12), [#allocation3], %s843_s4 }
  0x4d   : > { %s189_s5 = scalar_lea.vmem (!%p796_p12), [#allocation2], %s427_s27  ;;  %p927_p8 = scmp.ne.s32.totalorder (!%p796_p12), %s922_s21, 0 }
  0x52   : > { %621 = dma.done.wait (%p927_p8), %s186_s18, 128  }
  0x53   : > { %623 = vsyncadd (%p927_p8), %s186_s18, 4294967168  ;;  %s195_s25 = scalar_lea.sflag [#allocation6], %s843_s4  ;;  %s198_s7 = scalar_lea.vmem [#allocation5], %s427_s27 }
  0x54   : > { %625 = dma.done.wait (%p927_p8), %s195_s25, 128  }
  0x55   : > { %627 = vsyncadd (%p927_p8), %s195_s25, 4294967168  ;;  %vm232_vm0 = vcmask 1043456   ;;  %v226_v0 = vld [vmem:[%s189_s5] sm:$0xf]  ;;  %v227_v1 = vld [vmem:[%s189_s5 + $0x4] sm:$0xf] }
  0x56   : > { %v228_v2 = vld [vmem:[%s198_s7] sm:$0xf]  ;;  %v229_v3 = vld [vmem:[%s198_s7 + $0x4] sm:$0xf]  ;;  %v247_v5 = vmul.f32 %v226_v0, %v226_v0  ;;  %v248_v6 = vmul.f32 %v227_v1, %v227_v1  ;;  %s429_s21 = sshll.u32 %s843_s4, 1  ;;  %s431_s16 = sshll.u32 %s646_s12, 5 }
  0x57   : > { %v230_v4 = vmul.f32 %v228_v2, %v226_v0  ;;  %v263_v7 = vmul.f32 %v228_v2, %v228_v2  ;;  %v231_v8 = vmul.f32 %v229_v3, %v227_v1  ;;  %v264_v9 = vmul.f32 %v229_v3, %v229_v3  ;;  %s223_s8 = scalar_lea.vmem [#allocation7], %s429_s21  ;;  %s869_s30 = scalar_lea.hbm %s918_s2, %s431_s16 }
  0x58   : > { %v249_v10 = vsel %vm232_vm0, %v247_v5, 0.0  ;;  %v256_v11 = vsel %vm232_vm0, %v248_v6, 0.0  ;;  %s311_s15 = sshll.u32 %s223_s8, 4  ;;  %vm291_vm1 = vcmask 1041409   ;;  %s296_s19 = scalar_lea.sflag [#allocation4], %s843_s4  ;;  %s864_s15 = int_to_ptr.vmem [resolvable:$true] %s311_s15 }
  0x59   : > { %v265_v12 = vsel %vm232_vm0, %v263_v7, 0.0  ;;  %v250_v13 = vrot.slane %v249_v10, 4  ;;  %v257_v14 = vrot.slane %v256_v11, 4  ;;  %v233_v15 = vsel %vm232_vm0, %v230_v4, 0.0  ;;  %s568_s26 = scalar_lea.vmem %s864_s15, 32  ;;  %p928_p2 = scmp.ne.s32.totalorder %s923_s22, 0 }
  0x5a   : > { %v266_v16 = vrot.slane %v265_v12, 4  ;;  %v272_v17 = vsel %vm232_vm0, %v264_v9, 0.0  ;;  %v240_v18 = vsel %vm232_vm0, %v231_v8, 0.0  ;;  %v234_v23 = vrot.slane %v233_v15, 4  ;;  %p569_p0 = scmp.ne.s32.totalorder %s864_s15, %s568_s26  ;;  %s661_s12 = smov [#allocation7]  }
  0x5b   : > { %v251_v19 = vadd.f32 %v250_v13, %v249_v10  ;;  %v258_v20 = vadd.f32 %v257_v14, %v256_v11  ;;  %v273_v21 = vrot.slane %v272_v17, 4  ;;  %v241_v27 = vrot.slane %v240_v18, 4  ;;  %s572_s28 = sshll.u32 %s661_s12, 4  ;;  %s573_s28 = int_to_ptr.vmem [resolvable:$false] %s572_s28 }
  0x5c   : > { %v267_v22 = vadd.f32 %v266_v16, %v265_v12  ;;  %v235_v33 = vadd.f32 %v234_v23, %v233_v15  ;;  %p570_p12 = pnand %p569_p0, %p928_p2  ;;  %s574_s6 = scalar_lea.vmem %s573_s28, 64 }
  0x5d   : > { %v252_v24 = vrot.slane %v251_v19, 2  ;;  %v259_v25 = vrot.slane %v258_v20, 2  ;;  %v274_v26 = vadd.f32 %v273_v21, %v272_v17  ;;  %v242_v37 = vadd.f32 %v241_v27, %v240_v18  ;;  %p575_p6 = scmp.lt.s32.totalorder %s864_s15, %s573_s28  ;;  %p576_p7 = scmp.lt.s32.totalorder %s574_s6, %s568_s26 }
  0x5e   : > { %v268_v28 = vrot.slane %v267_v22, 2  ;;  %v236_v43 = vrot.slane %v235_v33, 2  ;;  %p571_p13 = pneg %p570_p12 }
  0x5f   : > { %v253_v29 = vadd.f32 %v252_v24, %v251_v19  ;;  %v260_v30 = vadd.f32 %v259_v25, %v258_v20  ;;  %v275_v31 = vrot.slane %v274_v26, 2  ;;  %v243_v45 = vrot.slane %v242_v37, 2  ;;  %p577_p9 = por %p576_p7, %p575_p6 }
  0x60   : > { %v269_v32 = vadd.f32 %v268_v28, %v267_v22  ;;  %v237_v49 = vadd.f32 %v236_v43, %v235_v33 }
  0x61   : > { %v254_v34 = vrot.slane %v253_v29, 1  ;;  %v261_v35 = vrot.slane %v260_v30, 1  ;;  %v276_v36 = vadd.f32 %v275_v31, %v274_v26  ;;  %v244_v51 = vadd.f32 %v243_v45, %v242_v37  ;;  %p578_p11 = pnand %p577_p9, %p571_p13 }
  0x62   : > { %v270_v38 = vrot.slane %v269_v32, 1  ;;  %v238_v52 = vrot.slane %v237_v49, 1 }
  0x63   : > { %v255_v39 = vadd.f32 %v254_v34, %v253_v29  ;;  %v262_v40 = vadd.f32 %v261_v35, %v260_v30  ;;  %v277_v41 = vrot.slane %v276_v36, 1  ;;  %v245_v53 = vrot.slane %v244_v51, 1 }
  0x64   : > { %v271_v42 = vadd.f32 %v270_v38, %v269_v32  ;;  %v239_v54 = vadd.f32 %v238_v52, %v237_v49 }
  0x65   : > { %v278_v44 = vadd.f32 %v277_v41, %v276_v36  ;;  %v246_v55 = vadd.f32 %v245_v53, %v244_v51 }
  0x66   : > { %v279_v46 = vmul.f32 %v271_v42, %v255_v39 }
  0x67   : > { %v280_v47 = vmul.f32 %v278_v44, %v262_v40 }
  0x68   : > { %v281_v48 = vmax.f32 %v279_v46, 1e-16 }
  0x69   : > { %v282_v50 = vmax.f32 %v280_v47, 1e-16 }
  0x6a   : > { %504 = vrsqrt.f32 %v281_v48 }
  0x6b   : > { %506 = vrsqrt.f32 %v282_v50 }
  0x74   : > { %v505_v56 = vpop.eup %504 }
  0x75   : > { %v507_v57 = vpop.eup %506  ;;  %v285_v58 = vmul.f32 %v505_v56, %v239_v54 }
  0x76   : > { %v286_v59 = vmul.f32 %v507_v57, %v246_v55 }
  0x77   : > { %v287_v60 = vsub.f32 1.0, %v285_v58 }
  0x78   : > { %v288_v61 = vsub.f32 1.0, %v286_v59 }
  0x7a   : > { %v292_v62 = vsel %vm291_vm1, %v288_v61, %v287_v60 }
  0x7b   : > { %294 = vst [vmem:[%s223_s8] sm:$0x3] %v292_v62 }
  0x7c   : > { %581 = shalt.err (!%p578_p11)
}
  0x7d   : > { %s582_s3 = scalar_lea.hbm %s869_s30, 32  ;;  %s586_s18 = scalar_lea.hbm %s918_s2, 64 }
  0x7e   : > { %p583_p5 = scmp.ne.s32.totalorder %s869_s30, %s582_s3  ;;  %p587_p3 = scmp.lt.u32.totalorder %s869_s30, %s918_s2 }
  0x7f   : > { %p588_p4 = scmp.lt.u32.totalorder %s586_s18, %s582_s3  ;;  %p590_p0 = scmp.lt.u32.totalorder %s582_s3, %s869_s30 }
  0x80   : > { %p584_p10 = pnand %p583_p5, %p928_p2 }
  0x81   : > { %p589_p8 = por %p588_p4, %p587_p3 }
  0x82   : > { %p585_p1 = pneg %p584_p10 }
  0x83   : > { %p591_p12 = por %p590_p0, %p589_p8 }
  0x85   : > { %p592_p13 = pnand %p591_p12, %p585_p1 }
  0x87   : > { %595 = shalt.err (!%p592_p13)
}
  0x88   : > { %438 = dma.vmem_to_hbm [thread:$0]  (%p928_p2), %s864_s15, 32, %s869_s30, %s296_s19  }
  0x89 PF: > { %s323_s7 = sand.u32 1, %s634_s9   ;;  %p929_p6 = scmp.ne.s32.totalorder %s924_s24, 0 }
  0x8a   : > { %p930_p7 = scmp.ge.s32.totalorder %s654_s14, 2  ;;  %s324_s21 = scalar_lea.sflag [#allocation4], %s323_s7 }
  0x8c   : > { %p448_p9 = pnand %p930_p7, %p929_p6 }
  0x8e   : > { %629 = dma.done.wait (!%p448_p9), %s324_s21, 32  }
  0x8f   : > { %631 = vsyncadd (!%p448_p9), %s324_s21, 4294967264  ;;  %s21_s14 = sadd.s32 1, %s654_s14   ;;  %s931_s9 = smov %s638_s10 }
  0x90   : > { %p18_p11 = scmp.ge.s32.totalorder %s21_s14, 4   ;;  %s932_s10 = smov %s642_s11 }
  0x91   : > { %s933_s11 = smov %s733_s23  ;;  %s934_s12 = smov %s650_s13 }
  0x92   : > { %s935_s13 = smov %s937_s17  ;;  %20 = sbr.rel (!%p18_p11) target bundleno = 8 (0x8), region = 86 }
  0x99   :  { %329 = vsyncpa [#allocation3], 1 }
  0x9a   :  { %331 = vsyncpa [#allocation3 + $0x1], 1 }
  0x9b   :  { %332 = vsyncpa [#allocation6], 1 }
  0x9c   :  { %334 = vsyncpa [#allocation6 + $0x1], 1 }
  0x9d   :  { %335 = vsyncpa [#allocation4], 1 }
  0x9e   :  { %337 = vsyncpa [#allocation4 + $0x1], 1 }

</bundles_post_ra>
